<compile_context>
chip_gen: v7x
topology: tpu7x:2x2x1
jax: 0.10.0
libtpu: 0.0.40
codegen_flags: <defaults>
</compile_context>

<pallas_src>
from functools import partial

import jax
import jax.numpy as jnp
from jax.experimental import pallas as pl
from jax.experimental.pallas import tpu as pltpu


def _attn_kernel(x_ref, wqkv_ref, bqkv_ref, wp_ref, bp_ref, o_ref, *, scale):
    bt, l, c = x_ref.shape
    x = x_ref[...]                                   # (Bt, L, C) f32 original input
    x_flat = x.reshape(bt * l, c)

    # Fused q/k/v projection (BatchNorm affine pre-folded into the weights).
    # bf16 MXU operands, f32 accumulation; bias added in f32.
    qkv = jnp.dot(x_flat.astype(jnp.bfloat16), wqkv_ref[...],
                  preferred_element_type=jnp.float32) + bqkv_ref[...]
    q = qkv[:, :c].reshape(bt, l, c)
    k = qkv[:, c:2 * c].reshape(bt, l, c)
    v = qkv[:, 2 * c:].reshape(bt, l, c)

    # Attention scores: contract channel (last) dims directly — no k.T.
    s = jnp.einsum('bqc,bkc->bqk',
                   q.astype(jnp.bfloat16), k.astype(jnp.bfloat16),
                   preferred_element_type=jnp.float32) * scale
    s = s - jnp.max(s, axis=-1, keepdims=True)       # f32, max-stabilized
    p = jnp.exp(s)                                   # unnormalized probs (f32)
    denom = jnp.sum(p, axis=-1, keepdims=True)       # (Bt, L, 1)

    # Attend with unnormalized probs; normalize afterwards with an EUP
    # approximate reciprocal applied as a cheap (Bt, L, 1) scale.
    a = jnp.einsum('bqk,bkc->bqc',
                   p.astype(jnp.bfloat16), v.astype(jnp.bfloat16),
                   preferred_element_type=jnp.float32)
    a = a * pl.reciprocal(denom, approx=True)

    # Output projection + residual (residual uses the original, un-normalized x).
    out = jnp.dot(a.reshape(bt * l, c).astype(jnp.bfloat16), wp_ref[...],
                  preferred_element_type=jnp.float32) + bp_ref[...]
    o_ref[...] = (x + out.reshape(bt, l, c)).astype(o_ref.dtype)


def _pick_batch_tile(B, C, L, budget_bytes=24 << 20):
    """Largest divisor of B whose per-step working set fits the VMEM budget,
    capped so the grid keeps >= 2 steps (both v7x TensorCores get work)."""
    # rough per-batch working set: x/out (double-buffered), qkv, q/k/v, a in
    # f32 + bf16 copies, plus the (L,L) scores & probs in f32.
    per_b = 4 * (12 * L * C + 2 * L * L) + 2 * (4 * L * C + L * L)
    bt = max(1, budget_bytes // max(per_b, 1))
    bt = min(bt, B)
    if B >= 2:
        bt = min(bt, B // 2)
    while B % bt:
        bt -= 1
    return int(bt)


def self_attention_1d(x_ncl, params, eps=1e-5):
    """x_ncl: (B, C, L) float32, matching PyTorch Conv1d/BatchNorm1d layout."""
    B, C, L = x_ncl.shape
    x_blc = jnp.transpose(x_ncl, (0, 2, 1))          # (B, L, C)

    # --- BatchNorm1d (training-mode batch statistics) ---
    mean = jnp.mean(x_ncl, axis=(0, 2))                               # (C,)
    var = jnp.mean((x_ncl - mean[None, :, None]) ** 2, axis=(0, 2))   # biased
    gamma, beta = params["bn_gamma"], params["bn_beta"]
    inv = gamma * jax.lax.rsqrt(var + eps)
    bn_scale = inv                                   # h = x*bn_scale + bn_shift
    bn_shift = beta - mean * inv

    # Conv1d(k=1) weights: (C_out, C_in, 1) -> transposed (C_in, C_out).
    def wt(w):
        return jnp.transpose(w[:, :, 0], (1, 0))

    # Fold BN into each projection:  (x*s + t) @ W^T + b
    #   = x @ (diag(s) W^T) + (t @ W^T + b)
    def fold(w, b):
        w_t = wt(w)                                  # (C, C)
        return w_t * bn_scale[:, None], bn_shift @ w_t + b

    wq_f, bq_f = fold(params["wq"], params["bq"])
    wk_f, bk_f = fold(params["wk"], params["bk"])
    wv_f, bv_f = fold(params["wv"], params["bv"])

    # Fused QKV weight/bias; weights in bf16 (MXU), biases kept f32.
    w_qkv = jnp.concatenate([wq_f, wk_f, wv_f], axis=1).astype(jnp.bfloat16)  # (C, 3C)
    b_qkv = jnp.concatenate([bq_f, bk_f, bv_f]).reshape(1, 3 * C)             # f32
    wp_t = wt(params["wp"]).astype(jnp.bfloat16)                              # (C, C)
    bp = params["bp"].reshape(1, C)

    scale = float(C) ** (-0.5)
    bt = _pick_batch_tile(B, C, L)

    out_blc = pl.pallas_call(
        partial(_attn_kernel, scale=scale),
        out_shape=jax.ShapeDtypeStruct((B, L, C), x_ncl.dtype),
        grid_spec=pltpu.PrefetchScalarGridSpec(
            num_scalar_prefetch=0,
            grid=(B // bt,),
            in_specs=[
                pl.BlockSpec((bt, L, C), lambda i: (i, 0, 0)),   # x (B,L,C)
                pl.BlockSpec((C, 3 * C), lambda i: (0, 0)),      # fused W_qkv (bf16)
                pl.BlockSpec((1, 3 * C), lambda i: (0, 0)),      # fused b_qkv
                pl.BlockSpec((C, C), lambda i: (0, 0)),          # Wp^T (bf16)
                pl.BlockSpec((1, C), lambda i: (0, 0)),          # bp
            ],
            out_specs=pl.BlockSpec((bt, L, C), lambda i: (i, 0, 0)),
        ),
        compiler_params=pltpu.CompilerParams(
            dimension_semantics=("parallel",),
            vmem_limit_bytes=48 * 1024 * 1024,
        ),
    )(x_blc, w_qkv, b_qkv, wp_t, bp)

    return jnp.transpose(out_blc, (0, 2, 1))         # back to (B, C, L)


def init_params(key, c):
    ks = jax.random.split(key, 8)
    s = 0.1
    return {
        "bn_gamma": 1.0 + s * jax.random.normal(ks[0], (c,), jnp.float32),
        "bn_beta": s * jax.random.normal(ks[1], (c,), jnp.float32),
        # Conv1d(k=1) weights: (C_out, C_in, 1), biases: (C_out,)
        "wq": s * jax.random.normal(ks[2], (c, c, 1), jnp.float32),
        "bq": s * jax.random.normal(ks[3], (c,), jnp.float32),
        "wk": s * jax.random.normal(ks[4], (c, c, 1), jnp.float32),
        "bk": s * jax.random.normal(ks[5], (c,), jnp.float32),
        "wv": s * jax.random.normal(ks[6], (c, c, 1), jnp.float32),
        "bv": s * jax.random.normal(ks[7], (c,), jnp.float32),
        "wp": s * jax.random.normal(jax.random.fold_in(key, 100), (c, c, 1), jnp.float32),
        "bp": s * jax.random.normal(jax.random.fold_in(key, 101), (c,), jnp.float32),
    }


def _reference(x_ncl, params, eps=1e-5):
    """Pure-JAX f32 reference mirroring the PyTorch forward."""
    B, C, L = x_ncl.shape
    mean = jnp.mean(x_ncl, axis=(0, 2), keepdims=True)
    var = jnp.mean((x_ncl - mean) ** 2, axis=(0, 2), keepdims=True)
    h = (x_ncl - mean) / jnp.sqrt(var + eps)
    h = h * params["bn_gamma"][None, :, None] + params["bn_beta"][None, :, None]

    def conv1x1(w, b, t):   # t: (B, C, L)
        return jnp.einsum("oc,bcl->bol", w[:, :, 0], t) + b[None, :, None]

    q = conv1x1(params["wq"], params["bq"], h)
    k = conv1x1(params["wk"], params["bk"], h)
    v = conv1x1(params["wv"], params["bv"], h)
    qT = jnp.transpose(q, (0, 2, 1))                 # b h c
    w_ = jnp.einsum("bij,bjk->bik", qT, k) * (float(C) ** -0.5)
    w_ = jax.nn.softmax(w_, axis=2)
    w_t = jnp.transpose(w_, (0, 2, 1))
    h_ = jnp.einsum("bij,bjk->bik", v, w_t)
    h_ = conv1x1(params["wp"], params["bp"], h_)
    return x_ncl + h_


if __name__ == "__main__":
    B, C, L = 2, 16, 32
    key = jax.random.PRNGKey(0)
    kx, kp = jax.random.split(key)
    x = jax.random.normal(kx, (B, C, L), jnp.float32)
    params = init_params(kp, C)

    out = jax.block_until_ready(self_attention_1d(x, params))
    ref = _reference(x, params)

    assert out.shape == (B, C, L)
    err = float(jnp.max(jnp.abs(out - ref)))
    # bf16 MXU operands (f32 accumulation) -> looser tolerance than pure f32.
    assert err < 2e-2, err
    print("KERNEL_OK")
</pallas_src>

<mosaic_0001>
module attributes {stable_mosaic.version = 11 : i64} {
  func.func @_attn_kernel(%arg0: i32, %arg1: memref<1x32x16xf32, #tpu.memory_space<vmem>>, %arg2: memref<16x48xbf16, #tpu.memory_space<vmem>>, %arg3: memref<1x48xf32, #tpu.memory_space<vmem>>, %arg4: memref<16x16xbf16, #tpu.memory_space<vmem>>, %arg5: memref<1x16xf32, #tpu.memory_space<vmem>>, %arg6: memref<1x32x16xf32, #tpu.memory_space<vmem>>) attributes {dimension_semantics = [#tpu.dimension_semantics<parallel>], iteration_bounds = array<i64: 2>, scalar_prefetch = 0 : i64, scratch_operands = 0 : i64, tpu.core_type = #tpu.core_type<tc>, window_params = [{transform_indices = @transform_0, window_bounds = array<i64: 1, 32, 16>}, {pipeline_mode = #tpu.pipeline_mode<synchronous>, transform_indices = @transform_1, window_bounds = array<i64: 16, 48>}, {pipeline_mode = #tpu.pipeline_mode<synchronous>, transform_indices = @transform_2, window_bounds = array<i64: 1, 48>}, {pipeline_mode = #tpu.pipeline_mode<synchronous>, transform_indices = @transform_3, window_bounds = array<i64: 16, 16>}, {pipeline_mode = #tpu.pipeline_mode<synchronous>, transform_indices = @transform_4, window_bounds = array<i64: 1, 16>}, {transform_indices = @transform_5, window_bounds = array<i64: 1, 32, 16>}]} {
    %c0 = arith.constant 0 : index
    %c0_0 = arith.constant 0 : index
    %c0_1 = arith.constant 0 : index
    %0 = vector.load %arg1[%c0, %c0_0, %c0_1] : memref<1x32x16xf32, #tpu.memory_space<vmem>>, vector<1x32x16xf32>
    %1 = vector.shape_cast %0 : vector<1x32x16xf32> to vector<32x16xf32>
    %2 = arith.truncf %1 : vector<32x16xf32> to vector<32x16xbf16>
    %c0_2 = arith.constant 0 : index
    %c0_3 = arith.constant 0 : index
    %3 = vector.load %arg2[%c0_2, %c0_3] : memref<16x48xbf16, #tpu.memory_space<vmem>>, vector<16x48xbf16>
    %cst = arith.constant dense<0.000000e+00> : vector<32x48xf32>
    %4 = tpu.matmul %2, %3, %cst {dimension_numbers = #tpu.dot_dimension_numbers<[1], [0], [0], [1], [0, 0, 1, 1], [], []>} : vector<32x16xbf16>, vector<16x48xbf16>, vector<32x48xf32> -> vector<32x48xf32>
    %c0_4 = arith.constant 0 : index
    %c0_5 = arith.constant 0 : index
    %5 = vector.load %arg3[%c0_4, %c0_5] : memref<1x48xf32, #tpu.memory_space<vmem>>, vector<1x48xf32>
    %6 = vector.broadcast %5 : vector<1x48xf32> to vector<32x48xf32>
    %7 = arith.addf %4, %6 : vector<32x48xf32>
    %8 = vector.extract_strided_slice %7 {offsets = [0, 0], sizes = [32, 16], strides = [1, 1]} : vector<32x48xf32> to vector<32x16xf32>
    %9 = vector.shape_cast %8 : vector<32x16xf32> to vector<1x32x16xf32>
    %10 = vector.extract_strided_slice %7 {offsets = [0, 16], sizes = [32, 16], strides = [1, 1]} : vector<32x48xf32> to vector<32x16xf32>
    %11 = vector.shape_cast %10 : vector<32x16xf32> to vector<1x32x16xf32>
    %12 = vector.extract_strided_slice %7 {offsets = [0, 32], sizes = [32, 16], strides = [1, 1]} : vector<32x48xf32> to vector<32x16xf32>
    %13 = vector.shape_cast %12 : vector<32x16xf32> to vector<1x32x16xf32>
    %14 = arith.truncf %9 : vector<1x32x16xf32> to vector<1x32x16xbf16>
    %15 = arith.truncf %11 : vector<1x32x16xf32> to vector<1x32x16xbf16>
    "tpu.trace_start"() <{level = 10 : i32, message = "bqc,bkc->bqk"}> : () -> ()
    %cst_6 = arith.constant dense<0.000000e+00> : vector<1x32x32xf32>
    %16 = tpu.matmul %14, %15, %cst_6 {dimension_numbers = #tpu.dot_dimension_numbers<[2], [2], [1], [1], [0, 0, 0, 1, 1, 1], [0], [0]>} : vector<1x32x16xbf16>, vector<1x32x16xbf16>, vector<1x32x32xf32> -> vector<1x32x32xf32>
    "tpu.trace_stop"() : () -> ()
    %cst_7 = arith.constant 2.500000e-01 : f32
    %17 = vector.broadcast %cst_7 : f32 to vector<1x32x32xf32>
    %18 = arith.mulf %16, %17 : vector<1x32x32xf32>
    %cst_8 = arith.constant dense<0xFF800000> : vector<1x32xf32>
    %19 = vector.multi_reduction <maximumf>, %18, %cst_8 [2] : vector<1x32x32xf32> to vector<1x32xf32>
    %20 = vector.shape_cast %19 : vector<1x32xf32> to vector<1x32x1xf32>
    %21 = vector.broadcast %20 : vector<1x32x1xf32> to vector<1x32x32xf32>
    %22 = arith.subf %18, %21 : vector<1x32x32xf32>
    %23 = math.exp %22 : vector<1x32x32xf32>
    %cst_9 = arith.constant dense<0.000000e+00> : vector<1x32xf32>
    %24 = vector.multi_reduction <add>, %23, %cst_9 [2] : vector<1x32x32xf32> to vector<1x32xf32>
    %25 = vector.shape_cast %24 : vector<1x32xf32> to vector<1x32x1xf32>
    %26 = arith.truncf %23 : vector<1x32x32xf32> to vector<1x32x32xbf16>
    %27 = arith.truncf %13 : vector<1x32x16xf32> to vector<1x32x16xbf16>
    "tpu.trace_start"() <{level = 10 : i32, message = "bqk,bkc->bqc"}> : () -> ()
    %cst_10 = arith.constant dense<0.000000e+00> : vector<1x32x16xf32>
    %28 = tpu.matmul %26, %27, %cst_10 {dimension_numbers = #tpu.dot_dimension_numbers<[2], [1], [1], [2], [0, 0, 0, 1, 1, 2], [0], [0]>} : vector<1x32x32xbf16>, vector<1x32x16xbf16>, vector<1x32x16xf32> -> vector<1x32x16xf32>
    "tpu.trace_stop"() : () -> ()
    %29 = tpu.reciprocal %25 {approx = true} : vector<1x32x1xf32> -> vector<1x32x1xf32>
    %30 = vector.broadcast %29 : vector<1x32x1xf32> to vector<1x32x16xf32>
    %31 = arith.mulf %28, %30 : vector<1x32x16xf32>
    %32 = vector.shape_cast %31 : vector<1x32x16xf32> to vector<32x16xf32>
    %33 = arith.truncf %32 : vector<32x16xf32> to vector<32x16xbf16>
    %c0_11 = arith.constant 0 : index
    %c0_12 = arith.constant 0 : index
    %34 = vector.load %arg4[%c0_11, %c0_12] : memref<16x16xbf16, #tpu.memory_space<vmem>>, vector<16x16xbf16>
    %cst_13 = arith.constant dense<0.000000e+00> : vector<32x16xf32>
    %35 = tpu.matmul %33, %34, %cst_13 {dimension_numbers = #tpu.dot_dimension_numbers<[1], [0], [0], [1], [0, 0, 1, 1], [], []>} : vector<32x16xbf16>, vector<16x16xbf16>, vector<32x16xf32> -> vector<32x16xf32>
    %c0_14 = arith.constant 0 : index
    %c0_15 = arith.constant 0 : index
    %36 = vector.load %arg5[%c0_14, %c0_15] : memref<1x16xf32, #tpu.memory_space<vmem>>, vector<1x16xf32>
    %37 = vector.broadcast %36 : vector<1x16xf32> to vector<32x16xf32>
    %38 = arith.addf %35, %37 : vector<32x16xf32>
    %39 = vector.shape_cast %38 : vector<32x16xf32> to vector<1x32x16xf32>
    %40 = arith.addf %0, %39 : vector<1x32x16xf32>
    %c0_16 = arith.constant 0 : index
    %c0_17 = arith.constant 0 : index
    %c0_18 = arith.constant 0 : index
    %41 = vector.load %arg6[%c0_16, %c0_17, %c0_18] : memref<1x32x16xf32, #tpu.memory_space<vmem>>, vector<1x32x16xf32>
    tpu.vector_store %arg6[%c0_16, %c0_17, %c0_18], %40 {strides = array<i32>} : memref<1x32x16xf32, #tpu.memory_space<vmem>>, vector<1x32x16xf32>,
    return
  }
  func.func @transform_0(%arg0: i32) -> (i32, i32, i32) {
    %c0_i32 = arith.constant 0 : i32
    %c0_i32_0 = arith.constant 0 : i32
    %c0_i32_1 = arith.constant 0 : i32
    return %arg0, %c0_i32, %c0_i32_0 : i32, i32, i32
  }
  func.func @transform_1(%arg0: i32) -> (i32, i32) {
    %c0_i32 = arith.constant 0 : i32
    %c0_i32_0 = arith.constant 0 : i32
    %c0_i32_1 = arith.constant 0 : i32
    return %c0_i32, %c0_i32_0 : i32, i32
  }
  func.func @transform_2(%arg0: i32) -> (i32, i32) {
    %c0_i32 = arith.constant 0 : i32
    %c0_i32_0 = arith.constant 0 : i32
    %c0_i32_1 = arith.constant 0 : i32
    return %c0_i32, %c0_i32_0 : i32, i32
  }
  func.func @transform_3(%arg0: i32) -> (i32, i32) {
    %c0_i32 = arith.constant 0 : i32
    %c0_i32_0 = arith.constant 0 : i32
    %c0_i32_1 = arith.constant 0 : i32
    return %c0_i32, %c0_i32_0 : i32, i32
  }
  func.func @transform_4(%arg0: i32) -> (i32, i32) {
    %c0_i32 = arith.constant 0 : i32
    %c0_i32_0 = arith.constant 0 : i32
    %c0_i32_1 = arith.constant 0 : i32
    return %c0_i32, %c0_i32_0 : i32, i32
  }
  func.func @transform_5(%arg0: i32) -> (i32, i32, i32) {
    %c0_i32 = arith.constant 0 : i32
    %c0_i32_0 = arith.constant 0 : i32
    %c0_i32_1 = arith.constant 0 : i32
    return %arg0, %c0_i32, %c0_i32_0 : i32, i32, i32
  }
}

</mosaic_0001>

<bundles_post_ra>
// kernel: tpu_custom_call.1
= control target key start
LH: loop header
LB: loop body
LE: loop exit
PB: predicated region body
PF: predicated region fallthrough
CT: control target
= control target key end

     0   :  { %s756_s18 = smov 0   ;;  %s834_s0 = inlined_call_operand.vmem [shape: f32[2,32,16], index: 0, kind: input, shape index: {}]   ;;  %s835_s1 = inlined_call_operand.vmem [shape: bf16[16,48], index: 1, kind: input, shape index: {}]   ;;  %s836_s2 = inlined_call_operand.vmem [shape: f32[1,48], index: 2, kind: input, shape index: {}]   ;;  %s837_s3 = inlined_call_operand.vmem [shape: bf16[16,16], index: 3, kind: input, shape index: {}]   ;;  %s838_s4 = inlined_call_operand.vmem [shape: f32[1,16], index: 4, kind: input, shape index: {}]   ;;  %s839_s5 = inlined_call_operand.vmem [shape: f32[2,32,16], index: 5, kind: output, shape index: {}]  }
   0x1 LB: > { %s619_s19 = sadd.s32 4294967295, %s722_s18   ;;  %p623_p0 = scmp.ge.s32.totalorder %s722_s18, 1  ;;  %s722_s18 = sphi %s756_s18, %s15_s18  }
   0x2   : > { %p187_p1 = scmp.lt.s32.totalorder %s722_s18, 3 }
   0x4   : > { %p188_p2 = pnand %p623_p0, %p187_p1 }
   0x5   : > { %v698_v0 = vld [vmem:[%s835_s1] sm:$0xff] (!%p188_p2)   ;;  %p215_p3 = scmp.lt.s32.totalorder (!%p188_p2), %s619_s19, 1  ;;  %vm247_vm0 = vcmask (!%p188_p2), 130048   ;;  %s724_s28 = smov (!%p188_p2), 96   ;;  %vm376_vm1 = vcmask (!%p188_p2), 261120  }
   0x6   : > { %191 = sbr.rel (%p188_p2) target bundleno = 1194 (0x4aa), region = 40  ;;  %658 = vmatprep.subr.bf16.mxu0 (!%p188_p2), %v698_v0  ;;  %v628_v8 = vld [vmem:[%s836_s2] ss:$0 sm:$0xff] (!%p188_p2)  ;;  %s725_s29 = smov (!%p188_p2), 112  }
   0x7   : > { %659 = vmatpush3.bf16.msra.mxu0 (!%p188_p2), %v698_v0  ;;  %v699_v58 = vld [vmem:[%s837_s3] sm:$0xff] (!%p188_p2)  }
   0xd   : > { %s841_s19 = smov (!%p215_p3, %s619_s19), 1 }
   0xe   : > { %s642_s22 = sshll.u32 %s841_s19, 5 }
   0xf   : > { %s219_s25 = scalar_lea.vmem %s834_s0, %s642_s22  ;;  %s224_s11 = scalar_lea.vmem %s839_s5, %s642_s22 }
  0x10   : > { %v775_v1 = vld [vmem:[%s219_s25] sm:$0xff]  ;;  %v777_v2 = vld [vmem:[%s219_s25 + $0x8] sm:$0xff]  ;;  %v779_v3 = vld [vmem:[%s219_s25 + $0x10] sm:$0xff] }
  0x11   : > { %v230_v4 = vpack.c.bf16 %v777_v2, %v775_v1  ;;  %v783_v5 = vld [vmem:[%s219_s25 + $0x18] sm:$0xff] }
  0x12   : > { %v231_v6 = vpack.c.bf16 %v783_v5, %v779_v3 }
  0x13   : > { %660 = vmatprep.mubr.msk.bf16.mxu0 %vm247_vm0, %v230_v4 }
  0x14   : > { %661 = vmatmul.mubr.msk.bf16.vlgmr.msra.gmra.mrb[0].mxu0 %vm247_vm0, %v231_v6 }
  0xe7   : > { %v662_v7 = vpop.f32.mrb[0].mxu0 }
  0xe8   : > { %v288_v9 = vpop.f32.mrb[1].mxu0  ;;  %v297_v11 = vadd.f32 %v662_v7, %v628_v8 }
  0xe9   : > { %v663_v10 = vpop.f32.mrb[2].mxu0  ;;  %v289_v14 = vadd.f32 %v628_v8, %v288_v9 }
  0xea   : > { %v300_v12 = vadd.f32 %v663_v10, %v628_v8  ;;  %v291_v13 = vpop.f32.mrb[3].mxu0 }
  0xeb   : > { %v292_v15 = vadd.f32 %v628_v8, %v291_v13 }
  0xec   : > { %v304_v16 = vpack.c.bf16 %v300_v12, %v297_v11 }
  0xed   : > { %v303_v17 = vpack.c.bf16 %v292_v15, %v289_v14 }
  0xef   : > { %415 = vrot.lane.b32.xlu1 %v303_v17, %s724_s28  ;;  %307 = vrot.lane.b32.xlu0 %v303_v17, %s725_s29 }
  0xf0   : > { %668 = vmatprep.mubr.msk.bf16.mxu1 %vm247_vm0, %v303_v17  ;;  %v636_v17 = vld [vmem:[%s838_s4] ss:$0 sm:$0xff] }
  0xf3   : > { %309 = vrot.lane.b32.xlu0 %v304_v16, %s725_s29 }
 0x161   : > { %v416_v18 = vpop.permute.xlu1 %415  ;;  %v308_v19 = vpop.permute.xlu0 %307 }
 0x162   : > { %686 = vmatprep.subr.msk.bf16.mxu1 %vm247_vm0, %v308_v19  ;;  %672 = vmatprep.subr.bf16.mxu0 %v416_v18  ;;  %v318_v20 = vsel %vm247_vm0, %v308_v19, 0 }
 0x163   : > { %665 = vmatpush3.bf16.xpose.msra.mxu1 %v318_v20  ;;  %673 = vmatpush3.bf16.msra.mxu0 %v416_v18 }
 0x165   : > { %v310_v21 = vpop.permute.xlu0 %309 }
 0x166   : > { %687 = vmatprep.subr.msk.bf16.mxu1 %vm247_vm0, %v310_v21  ;;  %v321_v22 = vsel %vm247_vm0, %v310_v21, 0 }
 0x16b   : > { %667 = vmatpush3.bf16.xpose.msra.mxu1 %v321_v22 }
 0x172   : > { %669 = vmatmul.mubr.msk.bf16.vlgmr.msra.gmra.mrb[0].mxu1 %vm247_vm0, %v304_v16 }
 0x245   : > { %v670_v23 = vpop.f32.mrb[0].mxu1 }
 0x246   : > { %v374_v24 = vmul.f32 0.25, %v670_v23  ;;  %v357_v25 = vpop.f32.mrb[1].mxu1 }
 0x247   : > { %v372_v26 = vmul.f32 0.25, %v357_v25  ;;  %v671_v27 = vpop.f32.mrb[2].mxu1 }
 0x248   : > { %v360_v28 = vpop.f32.mrb[3].mxu1  ;;  %v383_v29 = vsel %vm376_vm1, %v374_v24, -inf  ;;  %v375_v30 = vmul.f32 0.25, %v671_v27 }
 0x249   : > { %384 = vmax.xlane.f32.xlu0 %v383_v29  ;;  %v377_v31 = vsel %vm376_vm1, %v372_v26, -inf  ;;  %v373_v32 = vmul.f32 0.25, %v360_v28 }
 0x24a   : > { %378 = vmax.xlane.f32.xlu1 %v377_v31  ;;  %v386_v33 = vsel %vm376_vm1, %v375_v30, -inf }
 0x24b   : > { %v380_v34 = vsel %vm376_vm1, %v373_v32, -inf }
 0x24e   : > { %387 = vmax.xlane.f32.xlu1 %v386_v33 }
 0x252   : > { %381 = vmax.xlane.f32.xlu1 %v380_v34 }
 0x263   : > { %417 = vrot.lane.b32.xlu1 %v304_v16, %s724_s28 }
 0x2d6   : > { %v385_v35 = vpop.xlane.xlu0 %384 }
 0x2d7   : > { %v391_v36 = vsub.f32 %v374_v24, %v385_v35  ;;  %v379_v37 = vpop.xlane.xlu1 %378 }
 0x2d8   : > { %v389_v38 = vsub.f32 %v372_v26, %v379_v37 }
 0x2d9   : > { %v397_v39 = vmul.f32 1.442695, %v391_v36 }
 0x2da   : > { %v393_v40 = vmul.f32 1.442695, %v389_v38 }
 0x2db   : > { %700 = vpow2.f32 %v397_v39  ;;  %v388_v41 = vpop.xlane.xlu1 %387 }
 0x2dc   : > { %702 = vpow2.f32 %v393_v40  ;;  %v392_v42 = vsub.f32 %v375_v30, %v388_v41 }
 0x2de   : > { %v399_v43 = vmul.f32 1.442695, %v392_v42 }
 0x2df   : > { %v382_v44 = vpop.xlane.xlu1 %381 }
 0x2e0   : > { %v390_v45 = vsub.f32 %v373_v32, %v382_v44  ;;  %704 = vpow2.f32 %v399_v43 }
 0x2e2   : > { %v395_v46 = vmul.f32 1.442695, %v390_v45 }
 0x2e3   : > { %v418_v47 = vpop.permute.xlu1 %417 }
 0x2e4   : > { %706 = vpow2.f32 %v395_v46  ;;  %674 = vmatprep.subr.bf16.mxu0 %v418_v47 }
 0x2e5   : > { %v701_v48 = vpop.eup %700  ;;  %675 = vmatpush3.bf16.msra.mxu0 %v418_v47 }
 0x2e6   : > { %v703_v49 = vpop.eup %702  ;;  %v407_v50 = vsel %vm376_vm1, %v701_v48, 0.0  ;;  %680 = vmatprep.subr.bf16.mxu0 %v699_v58 }
 0x2e7   : > { %408 = vadd.xlane.f32.xlu0 %v407_v50  ;;  %v401_v51 = vsel %vm376_vm1, %v703_v49, 0.0 }
 0x2e8   : > { %402 = vadd.xlane.f32.xlu1 %v401_v51 }
 0x2ea   : > { %v705_v52 = vpop.eup %704 }
 0x2eb   : > { %v414_v56 = vpack.c.bf16 %v705_v52, %v701_v48  ;;  %v410_v57 = vsel %vm376_vm1, %v705_v52, 0.0 }
 0x2ee   : > { %v707_v53 = vpop.eup %706 }
 0x2ef   : > { %v404_v54 = vsel %vm376_vm1, %v707_v53, 0.0  ;;  %v413_v55 = vpack.c.bf16 %v707_v53, %v703_v49 }
 0x2f0   : > { %405 = vadd.xlane.f32.xlu0 %v404_v54 }
 0x2f1   : > { %676 = vmatprep.mubr.msk.bf16.mxu0 %vm376_vm1, %v413_v55 }
 0x2f2   : > { %677 = vmatmul.mubr.msk.bf16.vlgmr.msra.gmra.mrb[4].mxu0 %vm376_vm1, %v414_v56 }
 0x2f3   : > { %681 = vmatpush3.bf16.msra.mxu0 %v699_v58 }
 0x2f4   : > { %411 = vadd.xlane.f32.xlu0 %v410_v57 }
 0x374   : > { %v409_v59 = vpop.xlane.xlu0 %408 }
 0x375   : > { %v403_v61 = vpop.xlane.xlu1 %402  ;;  %708 = vrcp.f32 %v409_v59 }
 0x376   : > { %710 = vrcp.f32 %v403_v61 }
 0x37d   : > { %v406_v60 = vpop.xlane.xlu0 %405 }
 0x37f   : > { %v709_v63 = vpop.eup %708 }
 0x380   : > { %v711_v4 = vpop.eup %710 }
 0x381   : > { %v412_v62 = vpop.xlane.xlu0 %411 }
 0x382   : > { %712 = vrcp.f32 %v412_v62 }
 0x383   : > { %714 = vrcp.f32 %v406_v60 }
 0x38c   : > { %v713_v7 = vpop.eup %712 }
 0x38d   : > { %v715_v9 = vpop.eup %714 }
 0x3c5   : > { %v678_v0 = vpop.f32.mrb[4].mxu0 }
 0x3c6   : > { %v461_v6 = vpop.f32.mrb[5].mxu0  ;;  %v482_v10 = vmul.f32 %v709_v63, %v678_v0 }
 0x3c7   : > { %v679_v8 = vpop.f32.mrb[6].mxu0  ;;  %v480_v13 = vmul.f32 %v711_v4, %v461_v6 }
 0x3c8   : > { %v483_v11 = vmul.f32 %v713_v7, %v679_v8  ;;  %v464_v12 = vpop.f32.mrb[7].mxu0 }
 0x3c9   : > { %v481_v14 = vmul.f32 %v715_v9, %v464_v12 }
 0x3ca   : > { %v485_v15 = vpack.c.bf16 %v483_v11, %v482_v10 }
 0x3cb   : > { %v484_v16 = vpack.c.bf16 %v481_v14, %v480_v13 }
 0x3cd   : > { %682 = vmatprep.mubr.msk.bf16.mxu0 %vm247_vm0, %v484_v16 }
 0x3ce   : > { %683 = vmatmul.mubr.msk.bf16.vlgmr.msra.gmra.mrb[8].mxu0 %vm247_vm0, %v485_v15 }
 0x4a1   : > { %v684_v18 = vpop.f32.mrb[8].mxu0 }
 0x4a2   : > { %v550_v19 = vadd.f32 %v684_v18, %v636_v17  ;;  %v541_v20 = vpop.f32.mrb[9].mxu0 }
 0x4a3   : > { %v542_v21 = vadd.f32 %v636_v17, %v541_v20  ;;  %v685_v22 = vpop.f32.mrb[10].mxu0 }
 0x4a4   : > { %v558_v23 = vadd.f32 %v550_v19, %v779_v3  ;;  %v553_v24 = vadd.f32 %v685_v22, %v636_v17  ;;  %v544_v25 = vpop.f32.mrb[11].mxu0 }
 0x4a5   : > { %v556_v26 = vadd.f32 %v542_v21, %v775_v1  ;;  %v545_v27 = vadd.f32 %v636_v17, %v544_v25 }
 0x4a6   : > { %562 = vst.msk [vmem:[%s224_s11 + $0x10] sm:$0xff] %vm247_vm0, %v558_v23  ;;  %v559_v28 = vadd.f32 %v553_v24, %v783_v5 }
 0x4a7   : > { %560 = vst.msk [vmem:[%s224_s11] sm:$0xff] %vm247_vm0, %v556_v26  ;;  %v557_v29 = vadd.f32 %v545_v27, %v777_v2 }
 0x4a8   : > { %563 = vst.msk [vmem:[%s224_s11 + $0x18] sm:$0xff] %vm247_vm0, %v559_v28 }
 0x4a9   : > { %561 = vst.msk [vmem:[%s224_s11 + $0x8] sm:$0xff] %vm247_vm0, %v557_v29 }
 0x4aa PF: > { %s15_s18 = sadd.s32 1, %s722_s18  }
 0x4ab   : > { %p12_p4 = scmp.ge.s32.totalorder %s15_s18, 4  }
 0x4ad   :  { %14 = sbr.rel (!%p12_p4) target bundleno = 1 (0x1), region = 70 }

</bundles_post_ra>
